<compile_context>
chip_gen: v7x
topology: tpu7x:2x2x1
jax: 0.10.0
libtpu: 0.0.40
codegen_flags: <defaults>
</compile_context>

<pallas_src>
import functools

import jax
import jax.numpy as jnp
from jax.experimental import pallas as pl
from jax.experimental.pallas import tpu as pltpu


def _round_up(v: int, m: int) -> int:
    return ((v + m - 1) // m) * m


def logreg_kernel(x_ref, wt_ref, b_ref, o_ref):
    # x_ref: [TB, Dp], wt_ref: [Dp, Op], b_ref: [1, Op], o_ref: [TB, Op]
    z = jnp.dot(x_ref[...], wt_ref[...], preferred_element_type=jnp.float32)
    z = z + b_ref[...]
    o_ref[...] = jax.nn.sigmoid(z).astype(o_ref.dtype)


@functools.partial(jax.jit, static_argnames=())
def logistic_regression_forward(x, weight, bias):
    """x: [B, D], weight: [O, D] (torch nn.Linear convention), bias: [O]."""
    B, D = x.shape
    O = weight.shape[0]

    # Pad feature / output dims to the vreg/MXU lane granule (128) so the MXU pass
    # and the output stores are lane-dense instead of heavily masked.
    Dp = _round_up(max(D, 1), 128)
    Op = _round_up(max(O, 1), 128)

    # Batch tile: large enough to amortize per-step overhead, small enough that
    # double-buffered x+y tiles stay well under the v7x 32 MiB default scoped VMEM.
    TB = 512 if B >= 512 else _round_up(B, 8)
    Bp = _round_up(B, TB)

    x_p = jnp.zeros((Bp, Dp), dtype=jnp.float32).at[:B, :D].set(x.astype(jnp.float32))
    # One-time padded W^T [Dp, Op] and bias [1, Op]; zero padding keeps padded
    # columns/rows inert (they are sliced off below).
    wt_p = jnp.zeros((Dp, Op), dtype=jnp.float32).at[:D, :O].set(
        weight.astype(jnp.float32).T
    )
    b_p = jnp.zeros((1, Op), dtype=jnp.float32).at[0, :O].set(bias.astype(jnp.float32))

    grid = (Bp // TB,)

    y_p = pl.pallas_call(
        logreg_kernel,
        out_shape=jax.ShapeDtypeStruct((Bp, Op), jnp.float32),
        grid_spec=pltpu.PrefetchScalarGridSpec(
            num_scalar_prefetch=0,
            grid=grid,
            in_specs=[
                pl.BlockSpec((TB, Dp), lambda i: (i, 0)),   # x tile, pipelined
                pl.BlockSpec((Dp, Op), lambda i: (0, 0)),   # W^T resident
                pl.BlockSpec((1, Op), lambda i: (0, 0)),    # bias resident
            ],
            out_specs=pl.BlockSpec((TB, Op), lambda i: (i, 0)),
        ),
        compiler_params=pltpu.CompilerParams(
            dimension_semantics=("parallel",),
        ),
    )(x_p, wt_p, b_p)

    return y_p[:B, :O]


if __name__ == "__main__":
    key = jax.random.PRNGKey(0)
    k_x, k_w, k_b = jax.random.split(key, 3)

    B, input_dim, output_dim = 8, 32, 16

    x = jax.random.normal(k_x, (B, input_dim), dtype=jnp.float32)
    # Deterministic param init (mimics nn.Linear's uniform(-1/sqrt(D), 1/sqrt(D)))
    bound = 1.0 / (input_dim ** 0.5)
    weight = jax.random.uniform(
        k_w, (output_dim, input_dim), minval=-bound, maxval=bound, dtype=jnp.float32
    )
    bias = jax.random.uniform(
        k_b, (output_dim,), minval=-bound, maxval=bound, dtype=jnp.float32
    )

    y = logistic_regression_forward(x, weight, bias)
    y = jax.block_until_ready(y)

    # Cross-check against plain JAX reference.
    y_ref = jax.nn.sigmoid(x @ weight.T + bias)
    assert y.shape == (B, output_dim)
    assert jnp.allclose(y, y_ref, atol=1e-5, rtol=1e-5)

    print("KERNEL_OK")
</pallas_src>

<mosaic_0001>
module attributes {stable_mosaic.version = 11 : i64} {
  func.func @logreg_kernel(%arg0: i32, %arg1: memref<8x128xf32, #tpu.memory_space<vmem>>, %arg2: memref<128x128xf32, #tpu.memory_space<vmem>>, %arg3: memref<1x128xf32, #tpu.memory_space<vmem>>, %arg4: memref<8x128xf32, #tpu.memory_space<vmem>>) attributes {dimension_semantics = [#tpu.dimension_semantics<parallel>], iteration_bounds = array<i64: 1>, scalar_prefetch = 0 : i64, scratch_operands = 0 : i64, tpu.core_type = #tpu.core_type<tc>, window_params = [{transform_indices = @transform_0, window_bounds = array<i64: 8, 128>}, {pipeline_mode = #tpu.pipeline_mode<synchronous>, transform_indices = @transform_1, window_bounds = array<i64: 128, 128>}, {pipeline_mode = #tpu.pipeline_mode<synchronous>, transform_indices = @transform_2, window_bounds = array<i64: 1, 128>}, {transform_indices = @transform_3, window_bounds = array<i64: 8, 128>}]} {
    %c0 = arith.constant 0 : index
    %c0_0 = arith.constant 0 : index
    %0 = vector.load %arg1[%c0, %c0_0] : memref<8x128xf32, #tpu.memory_space<vmem>>, vector<8x128xf32>
    %c0_1 = arith.constant 0 : index
    %c0_2 = arith.constant 0 : index
    %1 = vector.load %arg2[%c0_1, %c0_2] : memref<128x128xf32, #tpu.memory_space<vmem>>, vector<128x128xf32>
    %cst = arith.constant dense<0.000000e+00> : vector<8x128xf32>
    %2 = tpu.matmul %0, %1, %cst {dimension_numbers = #tpu.dot_dimension_numbers<[1], [0], [0], [1], [0, 0, 1, 1], [], []>} : vector<8x128xf32>, vector<128x128xf32>, vector<8x128xf32> -> vector<8x128xf32>
    %c0_3 = arith.constant 0 : index
    %c0_4 = arith.constant 0 : index
    %3 = vector.load %arg3[%c0_3, %c0_4] : memref<1x128xf32, #tpu.memory_space<vmem>>, vector<1x128xf32>
    %4 = vector.broadcast %3 : vector<1x128xf32> to vector<8x128xf32>
    %5 = arith.addf %2, %4 : vector<8x128xf32>
    %6 = arith.negf %5 : vector<8x128xf32>
    %7 = math.exp %6 : vector<8x128xf32>
    %cst_5 = arith.constant 1.000000e+00 : f32
    %8 = vector.broadcast %cst_5 : f32 to vector<8x128xf32>
    %9 = arith.addf %8, %7 : vector<8x128xf32>
    %10 = arith.divf %8, %9 : vector<8x128xf32>
    %c0_6 = arith.constant 0 : index
    %c0_7 = arith.constant 0 : index
    %11 = vector.load %arg4[%c0_6, %c0_7] : memref<8x128xf32, #tpu.memory_space<vmem>>, vector<8x128xf32>
    tpu.vector_store %arg4[%c0_6, %c0_7], %10 {strides = array<i32>} : memref<8x128xf32, #tpu.memory_space<vmem>>, vector<8x128xf32>,
    return
  }
  func.func @transform_0(%arg0: i32) -> (i32, i32) {
    %c0_i32 = arith.constant 0 : i32
    %c0_i32_0 = arith.constant 0 : i32
    return %arg0, %c0_i32 : i32, i32
  }
  func.func @transform_1(%arg0: i32) -> (i32, i32) {
    %c0_i32 = arith.constant 0 : i32
    %c0_i32_0 = arith.constant 0 : i32
    %c0_i32_1 = arith.constant 0 : i32
    return %c0_i32, %c0_i32_0 : i32, i32
  }
  func.func @transform_2(%arg0: i32) -> (i32, i32) {
    %c0_i32 = arith.constant 0 : i32
    %c0_i32_0 = arith.constant 0 : i32
    %c0_i32_1 = arith.constant 0 : i32
    return %c0_i32, %c0_i32_0 : i32, i32
  }
  func.func @transform_3(%arg0: i32) -> (i32, i32) {
    %c0_i32 = arith.constant 0 : i32
    %c0_i32_0 = arith.constant 0 : i32
    return %arg0, %c0_i32 : i32, i32
  }
}

</mosaic_0001>

<bundles_post_ra>
// kernel: logistic_regression_forward.1
= control target key start
LH: loop header
LB: loop body
LE: loop exit
PB: predicated region body
PF: predicated region fallthrough
CT: control target
= control target key end

     0   :  { %v240_v3 = vmov 0.0|0.0   ;;  %vm241_vm0 = vmmov 0   ;;  %v242_v6 = vmov 0.0   ;;  %s330_s0 = inlined_call_operand.vmem [shape: f32[8,128], index: 0, kind: input, shape index: {}]   ;;  %s331_s1 = inlined_call_operand.vmem [shape: f32[128,128], index: 1, kind: input, shape index: {}]   ;;  %s332_s2 = inlined_call_operand.vmem [shape: f32[1,128], index: 2, kind: input, shape index: {}]   ;;  %s333_s3 = inlined_call_operand.hbm [shape: f32[8,128], index: 3, kind: output, shape index: {}]  }
   0x1   :  { %v16_v0 = vld [vmem:[%s331_s1] sm:$0xff]  ;;  %v17_v1 = vld [vmem:[%s331_s1 + $0x8] sm:$0xff]  ;;  %v18_v2 = vld [vmem:[%s331_s1 + $0x10] sm:$0xff]  ;;  %184 = vmatprep.subr.bf16.mxu0 %v240_v3  ;;  %181 = vmatprep.mubr.msk.f32.mxu0 %vm241_vm0, %v242_v6 }
   0x2   :  { %v185_v4 = vpack.c.bf16 %v17_v1, %v16_v0  ;;  %v19_v5 = vld [vmem:[%s331_s1 + $0x18] sm:$0xff]  ;;  %v20_v8 = vld [vmem:[%s331_s1 + $0x20] sm:$0xff]  ;;  %v21_v9 = vld [vmem:[%s331_s1 + $0x28] sm:$0xff] }
   0x3   :  { %v188_v7 = vpack.c.bf16 %v19_v5, %v18_v2 }
   0x4   :  { %186 = vmatpush3.bf16.msra.mxu0 %v185_v4 }
   0x5   :  { %187 = vmatprep.subr.bf16.mxu0 %v240_v3 }
   0x6   :  { %8 = vsyncpa [#allocation3], 0  ;;  %v191_v10 = vpack.c.bf16 %v21_v9, %v20_v8  ;;  %v22_v11 = vld [vmem:[%s331_s1 + $0x30] sm:$0xff]  ;;  %v23_v12 = vld [vmem:[%s331_s1 + $0x38] sm:$0xff] }
   0x7   :  { %v194_v13 = vpack.c.bf16 %v23_v12, %v22_v11  ;;  %v24_v14 = vld [vmem:[%s331_s1 + $0x40] sm:$0xff]  ;;  %v25_v15 = vld [vmem:[%s331_s1 + $0x48] sm:$0xff]  ;;  %v26_v17 = vld [vmem:[%s331_s1 + $0x50] sm:$0xff] }
   0x8   :  { %189 = vmatpush3.bf16.msra.mxu0 %v188_v7  ;;  %v197_v16 = vpack.c.bf16 %v25_v15, %v24_v14  ;;  %v27_v18 = vld [vmem:[%s331_s1 + $0x58] sm:$0xff]  ;;  %v28_v20 = vld [vmem:[%s331_s1 + $0x60] sm:$0xff]  ;;  %v29_v21 = vld [vmem:[%s331_s1 + $0x68] sm:$0xff] }
   0x9   :  { %190 = vmatprep.subr.bf16.mxu0 %v240_v3  ;;  %v200_v19 = vpack.c.bf16 %v27_v18, %v26_v17  ;;  %v203_v22 = vpack.c.bf16 %v29_v21, %v28_v20  ;;  %v30_v23 = vld [vmem:[%s331_s1 + $0x70] sm:$0xff]  ;;  %v31_v24 = vld [vmem:[%s331_s1 + $0x78] sm:$0xff]  ;;  %v15_v26 = vld [vmem:[%s330_s0] sm:$0xff]  ;;  %s243_s1 = smov [#allocation2]  }
   0xa   :  { %v206_v25 = vpack.c.bf16 %v31_v24, %v30_v23  ;;  %v130_v27 = vld [vmem:[%s332_s2] ss:$0 sm:$0xff]  ;;  %s122_s21 = sshll.u32 %s243_s1, 4  ;;  %s123_s21 = int_to_ptr.vmem [resolvable:$true] %s122_s21 }
   0xb   :  { %s216_s22 = scalar_lea.vmem %s123_s21, 128  ;;  %p221_p1 = scmp.lt.s32.totalorder %s123_s21, %s123_s21 }
   0xc   :  { %192 = vmatpush3.bf16.msra.mxu0 %v191_v10  ;;  %p217_p0 = scmp.ne.s32.totalorder %s123_s21, %s216_s22  ;;  %p222_p2 = scmp.lt.s32.totalorder %s216_s22, %s216_s22 }
   0xd   :  { %193 = vmatprep.subr.bf16.mxu0 %v240_v3 }
   0xe   :  { %p223_p3 = por %p222_p2, %p221_p1 }
  0x10   :  { %195 = vmatpush3.bf16.msra.mxu0 %v194_v13  ;;  %p224_p4 = pnand %p223_p3, %p217_p0 }
  0x11   :  { %196 = vmatprep.subr.bf16.mxu0 %v240_v3 }
  0x14   :  { %198 = vmatpush3.bf16.msra.mxu0 %v197_v16 }
  0x15   :  { %199 = vmatprep.subr.bf16.mxu0 %v240_v3 }
  0x18   :  { %201 = vmatpush3.bf16.msra.mxu0 %v200_v19 }
  0x19   :  { %202 = vmatprep.subr.bf16.mxu0 %v240_v3 }
  0x1c   :  { %204 = vmatpush3.bf16.msra.mxu0 %v203_v22 }
  0x1d   :  { %205 = vmatprep.subr.bf16.mxu0 %v240_v3 }
  0x20   :  { %207 = vmatpush3.bf16.msra.mxu0 %v206_v25 }
  0x23   :  { %182 = vmatmul.mubr.f32.vlgmr.msra.gmra.mrb[0].mxu0 %v15_v26 }
  0xf6   :  { %v105_v28 = vpop.f32.mrb[0].mxu0 }
  0xf7   :  { %v106_v29 = vadd.f32 %v130_v27, %v105_v28  ;;  %v183_v30 = vpop.f32.mrb[1].mxu0 }
  0xf9   :  { %v131_v31 = vmul.f32 -1.442695, %v106_v29 }
  0xfb   :  { %212 = vpow2.f32 %v131_v31 }
 0x105   :  { %v213_v32 = vpop.eup %212 }
 0x106   :  { %v112_v33 = vadd.f32 1.0, %v213_v32 }
 0x108   :  { %214 = vrcp.f32 %v112_v33 }
 0x112   :  { %v215_v34 = vpop.eup %214 }
 0x113   :  { %115 = vst [vmem:[#allocation2] sm:$0xff] %v215_v34 }
 0x114   :  { %227 = shalt.err (!%p224_p4)
}
 0x115   :  { %s228_s23 = scalar_lea.hbm %s333_s3, 128 }
 0x116   :  { %p229_p5 = scmp.ne.s32.totalorder %s333_s3, %s228_s23  ;;  %p232_p6 = scmp.lt.u32.totalorder %s228_s23, %s333_s3 }
 0x118   :  { %p234_p7 = pnand %p232_p6, %p229_p5 }
 0x11a   :  { %237 = shalt.err (!%p234_p7)
}
 0x11b   :  { %125 = dma.vmem_to_hbm [thread:$0]  %s123_s21, 128, %s333_s3, [#allocation3]  }
 0x11c   :  { %238 = dma.done.wait [#allocation3], 128  }
 0x11d   :  { %239 = vsyncadd [#allocation3], 4294967168 }
 0x11e   :  { %129 = vsyncpa [#allocation3], 1 }

</bundles_post_ra>
